<compile_context>
chip_gen: v7x
topology: tpu7x:2x2x1
jax: 0.10.0
libtpu: 0.0.40
codegen_flags: <defaults>
</compile_context>

<pallas_src>
import functools
import math

import jax
import jax.numpy as jnp
from jax import lax
from jax.experimental import pallas as pl
from jax.experimental.pallas import tpu as pltpu


def self_attention_kernel(x_ref, wq_ref, wk_ref, wv_ref, b_in_ref,
                          wbig_ref, wo_ref, bo_ref, out_ref, *, n_batch):
    """Fused forward pass; every row index is already (l, n)-interleaved."""
    G = x_ref.shape[0]                              # L * N rows
    x = x_ref[...].astype(jnp.bfloat16)             # (G, E), rows g' = l*N + m

    # ---- in-projection of the raw activations (position-independent) -------
    # y_c[g', :] = x[g', :] @ W_c^T ; the 1/sqrt(E) query scale is folded into
    # wq_ref.  Three separate 32-wide chunks -> no lane slicing anywhere.
    y_q = jnp.dot(x, wq_ref[...], preferred_element_type=jnp.float32)
    y_k = jnp.dot(x, wk_ref[...], preferred_element_type=jnp.float32)
    y_v = jnp.dot(x, wv_ref[...], preferred_element_type=jnp.float32)

    # ---- per-position W1/W2/W3 mixing as block-diagonal (G, G) matmuls ------
    # wbig[c, l*N+n, l*N+m] = W_{c+1}[l, n, m]; output rows are (l, n)-ordered.
    b_in = b_in_ref[...]                                            # (3, E)
    q = jnp.dot(wbig_ref[0], y_q.astype(jnp.bfloat16),
                preferred_element_type=jnp.float32) + b_in[0:1, :]
    k = jnp.dot(wbig_ref[1], y_k.astype(jnp.bfloat16),
                preferred_element_type=jnp.float32) + b_in[1:2, :]
    v = jnp.dot(wbig_ref[2], y_v.astype(jnp.bfloat16),
                preferred_element_type=jnp.float32) + b_in[2:3, :]

    # ---- single-head attention over interleaved rows ------------------------
    # One NT matmul (contracting dims (1,1): native MXU transposed-RHS feed,
    # no XLU transpose of k); mask out cross-batch (n != n') score entries.
    s = lax.dot_general(q.astype(jnp.bfloat16), k.astype(jnp.bfloat16),
                        (((1,), (1,)), ((), ())),
                        preferred_element_type=jnp.float32)         # (G, G)
    row_b = lax.broadcasted_iota(jnp.int32, (G, G), 0) % n_batch
    col_b = lax.broadcasted_iota(jnp.int32, (G, G), 1) % n_batch
    s = jnp.where(row_b == col_b, s, -1e30)
    s = s - jnp.max(s, axis=-1, keepdims=True)
    p = jnp.exp(s)
    p = p * pl.reciprocal(jnp.sum(p, axis=-1, keepdims=True), approx=True)
    ctx = jnp.dot(p.astype(jnp.bfloat16), v.astype(jnp.bfloat16),
                  preferred_element_type=jnp.float32)               # (G, E)

    # ---- out-projection; rows already (L, N)-ordered -> contiguous store ----
    out_ref[...] = jnp.dot(ctx.astype(jnp.bfloat16), wo_ref[...],
                           preferred_element_type=jnp.float32) + bo_ref[...]


def self_attention(x, params):
    L, N, E = x.shape
    G = L * N
    # Contiguous reshape only (metadata bitcast, no HLO copy/transpose/tile).
    x_flat = x.reshape(G, E)                 # row g' = l*N + m
    args = (x_flat,
            params["wq_scaled_bf16"], params["wk_t_bf16"], params["wv_t_bf16"],
            params["b_in"], params["wbig_bf16"], params["wo_t_bf16"],
            params["bo"])
    kernel = functools.partial(self_attention_kernel, n_batch=N)
    out_flat = pl.pallas_call(
        kernel,
        out_shape=jax.ShapeDtypeStruct((G, E), jnp.float32),
        in_specs=[pl.BlockSpec(memory_space=pltpu.MemorySpace.VMEM)] * len(args),
        out_specs=pl.BlockSpec(memory_space=pltpu.MemorySpace.VMEM),
    )(*args)
    # Rows are already (l, n)-interleaved -> this reshape is free (no transpose).
    return out_flat.reshape(L, N, E)


def init_params(key, L, N, E):
    """Deterministic parameters matching the PyTorch module's init, plus the
    compact pre-fused tensors consumed by the kernel."""
    std = 1.0 / math.sqrt(E)
    ks = jax.random.split(key, 5)
    W1 = jax.random.uniform(ks[0], (L, N, N), jnp.float32, -std, std)
    W2 = jax.random.uniform(ks[1], (L, N, N), jnp.float32, -std, std)
    W3 = jax.random.uniform(ks[2], (L, N, N), jnp.float32, -std, std)

    # nn.MultiheadAttention(E, 1, bias=True): in_proj_weight xavier-uniform,
    # in_proj_bias zeros, out_proj Linear(E, E) (kaiming bound, bias zeroed).
    bound_in = math.sqrt(6.0 / (E + E))
    in_proj_w = jax.random.uniform(ks[3], (3 * E, E), jnp.float32, -bound_in, bound_in)
    in_proj_b = jnp.zeros((3 * E,), jnp.float32)
    bound_out = 1.0 / math.sqrt(E)
    out_proj_w = jax.random.uniform(ks[4], (E, E), jnp.float32, -bound_out, bound_out)
    out_proj_b = jnp.zeros((E,), jnp.float32)

    wq, wk, wv = in_proj_w[0:E], in_proj_w[E:2 * E], in_proj_w[2 * E:3 * E]
    bq, bk, bv = in_proj_b[0:E], in_proj_b[E:2 * E], in_proj_b[2 * E:3 * E]
    scale = 1.0 / math.sqrt(E)               # num_heads = 1 -> head_dim = E

    # Block-diagonal per-position mixing: wbig[c, l*N+n, l*N+m] = W_{c+1}[l,n,m]
    Wstack = jnp.stack([W1, W2, W3], axis=0)                       # (3, L, N, N)
    eyeL = jnp.eye(L, dtype=jnp.float32)
    wbig = jnp.einsum('clnm,lp->clnpm', Wstack, eyeL).reshape(3, L * N, L * N)

    b_in = jnp.stack([bq * scale, bk, bv], axis=0)                 # (3, E)

    return dict(
        # raw params for the pure-JAX reference
        W1=W1, W2=W2, W3=W3,
        wq_t=wq.T, wk_t=wk.T, wv_t=wv.T, wo_t=out_proj_w.T,
        bq=bq.reshape(1, E), bk=bk.reshape(1, E), bv=bv.reshape(1, E),
        bo=out_proj_b.reshape(1, E),
        # compact, pre-fused kernel params (no E-broadcast, no wrapper tiling)
        wq_scaled_bf16=(wq.T * scale).astype(jnp.bfloat16),
        wk_t_bf16=wk.T.astype(jnp.bfloat16),
        wv_t_bf16=wv.T.astype(jnp.bfloat16),
        wo_t_bf16=out_proj_w.T.astype(jnp.bfloat16),
        wbig_bf16=wbig.astype(jnp.bfloat16),
        b_in=b_in,
    )


def reference(x, p):
    """Pure-JAX reference of the same forward pass (for validation)."""
    L, N, E = x.shape
    query = jnp.einsum('lnm,lme->lne', p["W1"], x)
    key = jnp.einsum('lnm,lme->lne', p["W2"], x)
    value = jnp.einsum('lnm,lme->lne', p["W3"], x)
    q = (query @ p["wq_t"] + p["bq"]) / math.sqrt(E)
    k = key @ p["wk_t"] + p["bk"]
    v = value @ p["wv_t"] + p["bv"]
    s = jnp.einsum('lne,sne->nls', q, k)
    a = jax.nn.softmax(s, axis=-1)
    o = jnp.einsum('nls,sne->lne', a, v)
    return o @ p["wo_t"] + p["bo"]


if __name__ == "__main__":
    L, N, E = 8, 2, 32          # seq_len, batch, embed_dim
    key = jax.random.PRNGKey(0)
    kx, kp = jax.random.split(key)
    x = jax.random.normal(kx, (L, N, E), jnp.float32)
    params = init_params(kp, L, N, E)

    out = jax.block_until_ready(self_attention(x, params))

    ref = jax.block_until_ready(reference(x, params))
    assert out.shape == (L, N, E)
    assert bool(jnp.allclose(out, ref, atol=1e-2, rtol=1e-2)), "mismatch vs reference"

    print("KERNEL_OK")
</pallas_src>

<mosaic_0001>
module attributes {stable_mosaic.version = 11 : i64} {
  func.func @self_attention_kernel(%arg0: memref<16x32xf32, #tpu.memory_space<vmem>>, %arg1: memref<32x32xbf16, #tpu.memory_space<vmem>>, %arg2: memref<32x32xbf16, #tpu.memory_space<vmem>>, %arg3: memref<32x32xbf16, #tpu.memory_space<vmem>>, %arg4: memref<3x32xf32, #tpu.memory_space<vmem>>, %arg5: memref<3x16x16xbf16, #tpu.memory_space<vmem>>, %arg6: memref<32x32xbf16, #tpu.memory_space<vmem>>, %arg7: memref<1x32xf32, #tpu.memory_space<vmem>>, %arg8: memref<16x32xf32, #tpu.memory_space<vmem>>) attributes {dimension_semantics = [], scalar_prefetch = 0 : i64, scratch_operands = 0 : i64, tpu.core_type = #tpu.core_type<tc>} {
    %c0 = arith.constant 0 : index
    %c0_0 = arith.constant 0 : index
    %0 = vector.load %arg0[%c0, %c0_0] : memref<16x32xf32, #tpu.memory_space<vmem>>, vector<16x32xf32>
    %1 = arith.truncf %0 : vector<16x32xf32> to vector<16x32xbf16>
    %c0_1 = arith.constant 0 : index
    %c0_2 = arith.constant 0 : index
    %2 = vector.load %arg1[%c0_1, %c0_2] : memref<32x32xbf16, #tpu.memory_space<vmem>>, vector<32x32xbf16>
    %cst = arith.constant dense<0.000000e+00> : vector<16x32xf32>
    %3 = tpu.matmul %1, %2, %cst {dimension_numbers = #tpu.dot_dimension_numbers<[1], [0], [0], [1], [0, 0, 1, 1], [], []>} : vector<16x32xbf16>, vector<32x32xbf16>, vector<16x32xf32> -> vector<16x32xf32>
    %c0_3 = arith.constant 0 : index
    %c0_4 = arith.constant 0 : index
    %4 = vector.load %arg2[%c0_3, %c0_4] : memref<32x32xbf16, #tpu.memory_space<vmem>>, vector<32x32xbf16>
    %cst_5 = arith.constant dense<0.000000e+00> : vector<16x32xf32>
    %5 = tpu.matmul %1, %4, %cst_5 {dimension_numbers = #tpu.dot_dimension_numbers<[1], [0], [0], [1], [0, 0, 1, 1], [], []>} : vector<16x32xbf16>, vector<32x32xbf16>, vector<16x32xf32> -> vector<16x32xf32>
    %c0_6 = arith.constant 0 : index
    %c0_7 = arith.constant 0 : index
    %6 = vector.load %arg3[%c0_6, %c0_7] : memref<32x32xbf16, #tpu.memory_space<vmem>>, vector<32x32xbf16>
    %cst_8 = arith.constant dense<0.000000e+00> : vector<16x32xf32>
    %7 = tpu.matmul %1, %6, %cst_8 {dimension_numbers = #tpu.dot_dimension_numbers<[1], [0], [0], [1], [0, 0, 1, 1], [], []>} : vector<16x32xbf16>, vector<32x32xbf16>, vector<16x32xf32> -> vector<16x32xf32>
    %c0_9 = arith.constant 0 : index
    %c0_10 = arith.constant 0 : index
    %8 = vector.load %arg4[%c0_9, %c0_10] : memref<3x32xf32, #tpu.memory_space<vmem>>, vector<3x32xf32>
    %c0_11 = arith.constant 0 : index
    %c0_12 = arith.constant 0 : index
    %c0_13 = arith.constant 0 : index
    %9 = vector.load %arg5[%c0_11, %c0_12, %c0_13] : memref<3x16x16xbf16, #tpu.memory_space<vmem>>, vector<1x16x16xbf16>
    %10 = vector.shape_cast %9 : vector<1x16x16xbf16> to vector<16x16xbf16>
    %11 = arith.truncf %3 : vector<16x32xf32> to vector<16x32xbf16>
    %cst_14 = arith.constant dense<0.000000e+00> : vector<16x32xf32>
    %12 = tpu.matmul %10, %11, %cst_14 {dimension_numbers = #tpu.dot_dimension_numbers<[1], [0], [0], [1], [0, 0, 1, 1], [], []>} : vector<16x16xbf16>, vector<16x32xbf16>, vector<16x32xf32> -> vector<16x32xf32>
    %13 = vector.extract_strided_slice %8 {offsets = [0, 0], sizes = [1, 32], strides = [1, 1]} : vector<3x32xf32> to vector<1x32xf32>
    %14 = vector.broadcast %13 : vector<1x32xf32> to vector<16x32xf32>
    %15 = arith.addf %12, %14 : vector<16x32xf32>
    %c1 = arith.constant 1 : index
    %c0_15 = arith.constant 0 : index
    %c0_16 = arith.constant 0 : index
    %16 = vector.load %arg5[%c1, %c0_15, %c0_16] : memref<3x16x16xbf16, #tpu.memory_space<vmem>>, vector<1x16x16xbf16>
    %17 = vector.shape_cast %16 : vector<1x16x16xbf16> to vector<16x16xbf16>
    %18 = arith.truncf %5 : vector<16x32xf32> to vector<16x32xbf16>
    %cst_17 = arith.constant dense<0.000000e+00> : vector<16x32xf32>
    %19 = tpu.matmul %17, %18, %cst_17 {dimension_numbers = #tpu.dot_dimension_numbers<[1], [0], [0], [1], [0, 0, 1, 1], [], []>} : vector<16x16xbf16>, vector<16x32xbf16>, vector<16x32xf32> -> vector<16x32xf32>
    %20 = vector.extract_strided_slice %8 {offsets = [1, 0], sizes = [1, 32], strides = [1, 1]} : vector<3x32xf32> to vector<1x32xf32>
    %21 = vector.broadcast %20 : vector<1x32xf32> to vector<16x32xf32>
    %22 = arith.addf %19, %21 : vector<16x32xf32>
    %c2 = arith.constant 2 : index
    %c0_18 = arith.constant 0 : index
    %c0_19 = arith.constant 0 : index
    %23 = vector.load %arg5[%c2, %c0_18, %c0_19] : memref<3x16x16xbf16, #tpu.memory_space<vmem>>, vector<1x16x16xbf16>
    %24 = vector.shape_cast %23 : vector<1x16x16xbf16> to vector<16x16xbf16>
    %25 = arith.truncf %7 : vector<16x32xf32> to vector<16x32xbf16>
    %cst_20 = arith.constant dense<0.000000e+00> : vector<16x32xf32>
    %26 = tpu.matmul %24, %25, %cst_20 {dimension_numbers = #tpu.dot_dimension_numbers<[1], [0], [0], [1], [0, 0, 1, 1], [], []>} : vector<16x16xbf16>, vector<16x32xbf16>, vector<16x32xf32> -> vector<16x32xf32>
    %27 = vector.extract_strided_slice %8 {offsets = [2, 0], sizes = [1, 32], strides = [1, 1]} : vector<3x32xf32> to vector<1x32xf32>
    %28 = vector.broadcast %27 : vector<1x32xf32> to vector<16x32xf32>
    %29 = arith.addf %26, %28 : vector<16x32xf32>
    %30 = arith.truncf %15 : vector<16x32xf32> to vector<16x32xbf16>
    %31 = arith.truncf %22 : vector<16x32xf32> to vector<16x32xbf16>
    %cst_21 = arith.constant dense<0.000000e+00> : vector<16x16xf32>
    %32 = tpu.matmul %30, %31, %cst_21 {dimension_numbers = #tpu.dot_dimension_numbers<[1], [1], [0], [0], [0, 0, 1, 0], [], []>} : vector<16x32xbf16>, vector<16x32xbf16>, vector<16x16xf32> -> vector<16x16xf32>
    %33 = tpu.iota {dimensions = array<i32: 0>} : vector<16x16xi32>
    %c2_i32 = arith.constant 2 : i32
    %c0_i32 = arith.constant 0 : i32
    %34 = arith.cmpi eq, %c2_i32, %c0_i32 : i32
    %c1_i32 = arith.constant 1 : i32
    %35 = arith.select %34, %c1_i32, %c2_i32 : i32
    %36 = vector.broadcast %35 : i32 to vector<16x16xi32>
    %37 = arith.remsi %33, %36 : vector<16x16xi32>
    %c0_i32_22 = arith.constant 0 : i32
    %38 = vector.broadcast %c0_i32_22 : i32 to vector<16x16xi32>
    %39 = arith.cmpi ne, %37, %38 : vector<16x16xi32>
    %c0_i32_23 = arith.constant 0 : i32
    %40 = vector.broadcast %c0_i32_23 : i32 to vector<16x16xi32>
    %41 = arith.cmpi slt, %37, %40 : vector<16x16xi32>
    %c0_i32_24 = arith.constant 0 : i32
    %42 = arith.cmpi slt, %35, %c0_i32_24 : i32
    %43 = vector.broadcast %42 : i1 to vector<16x16xi1>
    %44 = vector.broadcast %43 : vector<16x16xi1> to vector<16x16xi1>
    %45 = arith.xori %41, %44 : vector<16x16xi1>
    %46 = arith.andi %45, %39 : vector<16x16xi1>
    %47 = vector.broadcast %35 : i32 to vector<16x16xi32>
    %48 = arith.addi %37, %47 : vector<16x16xi32>
    %49 = arith.select %46, %48, %37 : vector<16x16xi1>, vector<16x16xi32>
    %50 = tpu.iota {dimensions = array<i32: 1>} : vector<16x16xi32>
    %c2_i32_25 = arith.constant 2 : i32
    %c0_i32_26 = arith.constant 0 : i32
    %51 = arith.cmpi eq, %c2_i32_25, %c0_i32_26 : i32
    %c1_i32_27 = arith.constant 1 : i32
    %52 = arith.select %51, %c1_i32_27, %c2_i32_25 : i32
    %53 = vector.broadcast %52 : i32 to vector<16x16xi32>
    %54 = arith.remsi %50, %53 : vector<16x16xi32>
    %c0_i32_28 = arith.constant 0 : i32
    %55 = vector.broadcast %c0_i32_28 : i32 to vector<16x16xi32>
    %56 = arith.cmpi ne, %54, %55 : vector<16x16xi32>
    %c0_i32_29 = arith.constant 0 : i32
    %57 = vector.broadcast %c0_i32_29 : i32 to vector<16x16xi32>
    %58 = arith.cmpi slt, %54, %57 : vector<16x16xi32>
    %c0_i32_30 = arith.constant 0 : i32
    %59 = arith.cmpi slt, %52, %c0_i32_30 : i32
    %60 = vector.broadcast %59 : i1 to vector<16x16xi1>
    %61 = vector.broadcast %60 : vector<16x16xi1> to vector<16x16xi1>
    %62 = arith.xori %58, %61 : vector<16x16xi1>
    %63 = arith.andi %62, %56 : vector<16x16xi1>
    %64 = vector.broadcast %52 : i32 to vector<16x16xi32>
    %65 = arith.addi %54, %64 : vector<16x16xi32>
    %66 = arith.select %63, %65, %54 : vector<16x16xi1>, vector<16x16xi32>
    %67 = arith.cmpi eq, %49, %66 : vector<16x16xi32>
    %cst_31 = arith.constant -1.000000e+30 : f32
    %68 = vector.broadcast %cst_31 : f32 to vector<16x16xf32>
    %69 = arith.select %67, %32, %68 : vector<16x16xi1>, vector<16x16xf32>
    %cst_32 = arith.constant dense<0xFF800000> : vector<16xf32>
    %70 = vector.multi_reduction <maximumf>, %69, %cst_32 [1] : vector<16x16xf32> to vector<16xf32>
    %71 = vector.shape_cast %70 : vector<16xf32> to vector<16x1xf32>
    %72 = vector.broadcast %71 : vector<16x1xf32> to vector<16x16xf32>
    %73 = arith.subf %69, %72 : vector<16x16xf32>
    %74 = math.exp %73 : vector<16x16xf32>
    %cst_33 = arith.constant dense<0.000000e+00> : vector<16xf32>
    %75 = vector.multi_reduction <add>, %74, %cst_33 [1] : vector<16x16xf32> to vector<16xf32>
    %76 = vector.shape_cast %75 : vector<16xf32> to vector<16x1xf32>
    %77 = tpu.reciprocal %76 {approx = true} : vector<16x1xf32> -> vector<16x1xf32>
    %78 = vector.broadcast %77 : vector<16x1xf32> to vector<16x16xf32>
    %79 = arith.mulf %74, %78 : vector<16x16xf32>
    %80 = arith.truncf %79 : vector<16x16xf32> to vector<16x16xbf16>
    %81 = arith.truncf %29 : vector<16x32xf32> to vector<16x32xbf16>
    %cst_34 = arith.constant dense<0.000000e+00> : vector<16x32xf32>
    %82 = tpu.matmul %80, %81, %cst_34 {dimension_numbers = #tpu.dot_dimension_numbers<[1], [0], [0], [1], [0, 0, 1, 1], [], []>} : vector<16x16xbf16>, vector<16x32xbf16>, vector<16x32xf32> -> vector<16x32xf32>
    %83 = arith.truncf %82 : vector<16x32xf32> to vector<16x32xbf16>
    %c0_35 = arith.constant 0 : index
    %c0_36 = arith.constant 0 : index
    %84 = vector.load %arg6[%c0_35, %c0_36] : memref<32x32xbf16, #tpu.memory_space<vmem>>, vector<32x32xbf16>
    %cst_37 = arith.constant dense<0.000000e+00> : vector<16x32xf32>
    %85 = tpu.matmul %83, %84, %cst_37 {dimension_numbers = #tpu.dot_dimension_numbers<[1], [0], [0], [1], [0, 0, 1, 1], [], []>} : vector<16x32xbf16>, vector<32x32xbf16>, vector<16x32xf32> -> vector<16x32xf32>
    %c0_38 = arith.constant 0 : index
    %c0_39 = arith.constant 0 : index
    %86 = vector.load %arg7[%c0_38, %c0_39] : memref<1x32xf32, #tpu.memory_space<vmem>>, vector<1x32xf32>
    %87 = vector.broadcast %86 : vector<1x32xf32> to vector<16x32xf32>
    %88 = arith.addf %85, %87 : vector<16x32xf32>
    %c0_40 = arith.constant 0 : index
    %c0_41 = arith.constant 0 : index
    %89 = vector.load %arg8[%c0_40, %c0_41] : memref<16x32xf32, #tpu.memory_space<vmem>>, vector<16x32xf32>
    tpu.vector_store %arg8[%c0_40, %c0_41], %88 {strides = array<i32>} : memref<16x32xf32, #tpu.memory_space<vmem>>, vector<16x32xf32>,
    return
  }
}

</mosaic_0001>

<bundles_post_ra>
// kernel: tpu_custom_call.1
= control target key start
LH: loop header
LB: loop body
LE: loop exit
PB: predicated region body
PF: predicated region fallthrough
CT: control target
= control target key end

     0   :  { %13 = vsyncpa [#allocation3], 0  ;;  %s1189_s0 = inlined_call_operand.hbm [shape: f32[16,32], index: 0, kind: input, shape index: {}]   ;;  %s1190_s1 = inlined_call_operand.hbm [shape: bf16[32,32], index: 1, kind: input, shape index: {}]   ;;  %s1191_s2 = inlined_call_operand.hbm [shape: bf16[32,32], index: 2, kind: input, shape index: {}]   ;;  %s1192_s3 = inlined_call_operand.hbm [shape: bf16[32,32], index: 3, kind: input, shape index: {}]   ;;  %s1193_s4 = inlined_call_operand.vmem [shape: f32[3,32], index: 4, kind: input, shape index: {}]   ;;  %s1194_s5 = inlined_call_operand.hbm [shape: bf16[3,16,16], index: 5, kind: input, shape index: {}]   ;;  %s1195_s6 = inlined_call_operand.vmem [shape: bf16[32,32], index: 6, kind: input, shape index: {}]   ;;  %s1196_s7 = inlined_call_operand.vmem [shape: f32[1,32], index: 7, kind: input, shape index: {}]   ;;  %s1197_s8 = inlined_call_operand.hbm [shape: f32[16,32], index: 8, kind: output, shape index: {}]  }
   0x1   :  { %14 = vsyncpa [#allocation6], 0 }
   0x2   :  { %15 = vsyncpa [#allocation9], 0 }
   0x3   :  { %16 = vsyncpa [#allocation4], 0  ;;  %s976_s27 = smov [#allocation5]   ;;  %s836_s9 = scalar_lea.hbm %s1190_s1, 256 }
   0x4   :  { %s34_s28 = sshll.u32 %s976_s27, 4  ;;  %p837_p0 = scmp.ne.s32.totalorder %s1190_s1, %s836_s9  ;;  %s35_s28 = int_to_ptr.vmem [resolvable:$true] %s34_s28 }
   0x5   :  { %p840_p1 = scmp.lt.u32.totalorder %s836_s9, %s1190_s1 }
   0x7   :  { %p842_p2 = pnand %p840_p1, %p837_p0 }
   0x9   :  { %845 = shalt.err (!%p842_p2)
}
   0xa   :  { %s846_s14 = scalar_lea.vmem %s35_s28, 256  ;;  %p851_p4 = scmp.lt.s32.totalorder %s35_s28, %s35_s28 }
   0xb   :  { %p847_p3 = scmp.ne.s32.totalorder %s35_s28, %s846_s14  ;;  %p852_p5 = scmp.lt.s32.totalorder %s846_s14, %s846_s14 }
   0xd   :  { %p853_p6 = por %p852_p5, %p851_p4 }
   0xf   :  { %p854_p7 = pnand %p853_p6, %p847_p3 }
  0x11   :  { %857 = shalt.err (!%p854_p7)
}
  0x12   :  { %s977_s15 = smov 64   ;;  %s978_s16 = smov 4  }
  0x13   :  { %40 = dma.hbm_to_vmem [thread:$0]  %s1190_s1, 256, %s35_s28, [#allocation6], %s977_s15, %s977_s15, %s978_s16  }
  0x14   :  { %s979_s19 = smov [#allocation8]   ;;  %s980_s21 = smov [#allocation2]  }
  0x15   :  { %s58_s20 = sshll.u32 %s979_s19, 4  ;;  %s22_s22 = sshll.u32 %s980_s21, 4  ;;  %s59_s20 = int_to_ptr.vmem [resolvable:$true] %s58_s20  ;;  %s23_s22 = int_to_ptr.vmem [resolvable:$true] %s22_s22 }
  0x16   :  { %s858_s25 = scalar_lea.hbm %s1192_s3, 256 }
  0x17   :  { %p859_p8 = scmp.ne.s32.totalorder %s1192_s3, %s858_s25  ;;  %p862_p9 = scmp.lt.u32.totalorder %s858_s25, %s1192_s3 }
  0x19   :  { %p864_p10 = pnand %p862_p9, %p859_p8 }
  0x1b   :  { %867 = shalt.err (!%p864_p10)
}
  0x1c   :  { %s868_s1 = scalar_lea.vmem %s59_s20, 256  ;;  %p873_p12 = scmp.lt.s32.totalorder %s59_s20, %s59_s20 }
  0x1d   :  { %p869_p11 = scmp.ne.s32.totalorder %s59_s20, %s868_s1  ;;  %p874_p13 = scmp.lt.s32.totalorder %s868_s1, %s868_s1 }
  0x1f   :  { %p875_p0 = por %p874_p13, %p873_p12 }
  0x21   :  { %p876_p1 = pnand %p875_p0, %p869_p11 }
  0x23   :  { %879 = shalt.err (!%p876_p1)
}
  0x24   :  { %64 = dma.hbm_to_vmem [thread:$0]  %s1192_s3, 256, %s59_s20, [#allocation9], %s977_s15, %s977_s15, %s978_s16  }
  0x25   :  { %s880_s12 = scalar_lea.hbm %s1189_s0, 256 }
  0x26   :  { %p881_p2 = scmp.ne.s32.totalorder %s1189_s0, %s880_s12  ;;  %p884_p3 = scmp.lt.u32.totalorder %s880_s12, %s1189_s0 }
  0x28   :  { %p886_p4 = pnand %p884_p3, %p881_p2 }
  0x2a   :  { %889 = shalt.err (!%p886_p4)
}
  0x2b   :  { %s890_s19 = scalar_lea.vmem %s23_s22, 256  ;;  %p895_p6 = scmp.lt.s32.totalorder %s23_s22, %s23_s22 }
  0x2c   :  { %p891_p5 = scmp.ne.s32.totalorder %s23_s22, %s890_s19  ;;  %p896_p7 = scmp.lt.s32.totalorder %s890_s19, %s890_s19 }
  0x2e   :  { %p897_p8 = por %p896_p7, %p895_p6 }
  0x30   :  { %p898_p9 = pnand %p897_p8, %p891_p5 }
  0x32   :  { %901 = shalt.err (!%p898_p9)
}
  0x33   :  { %s981_s3 = smov 128   ;;  %s982_s20 = smov 8  }
  0x34   :  { %28 = dma.hbm_to_vmem [thread:$0]  %s1189_s0, 256, %s23_s22, [#allocation3], %s981_s3, %s981_s3, %s982_s20  }
  0x35   :  { %s983_s24 = smov [#allocation7]   ;;  %s984_s26 = smov [#allocation10]  }
  0x36   :  { %s46_s25 = sshll.u32 %s983_s24, 4  ;;  %s72_s27 = sshll.u32 %s984_s26, 4  ;;  %s47_s25 = int_to_ptr.vmem [resolvable:$true] %s46_s25  ;;  %s73_s27 = int_to_ptr.vmem [resolvable:$true] %s72_s27 }
  0x37   :  { %s902_s1 = scalar_lea.hbm %s1191_s2, 256 }
  0x38   :  { %p903_p10 = scmp.ne.s32.totalorder %s1191_s2, %s902_s1  ;;  %p906_p11 = scmp.lt.u32.totalorder %s902_s1, %s1191_s2 }
  0x3a   :  { %p908_p12 = pnand %p906_p11, %p903_p10 }
  0x3c   :  { %911 = shalt.err (!%p908_p12)
}
  0x3d   :  { %s912_s0 = scalar_lea.vmem %s47_s25, 256  ;;  %p917_p0 = scmp.lt.s32.totalorder %s47_s25, %s47_s25 }
  0x3e   :  { %p913_p13 = scmp.ne.s32.totalorder %s47_s25, %s912_s0  ;;  %p918_p1 = scmp.lt.s32.totalorder %s912_s0, %s912_s0 }
  0x40   :  { %p919_p2 = por %p918_p1, %p917_p0 }
  0x42   :  { %p920_p3 = pnand %p919_p2, %p913_p13 }
  0x44   :  { %923 = shalt.err (!%p920_p3)
}
  0x45   :  { %52 = dma.hbm_to_vmem [thread:$0]  %s1191_s2, 256, %s47_s25, [#allocation6], %s977_s15, %s977_s15, %s978_s16  }
  0x46   :  { %s924_s17 = scalar_lea.hbm %s1194_s5, 384 }
  0x47   :  { %p925_p4 = scmp.ne.s32.totalorder %s1194_s5, %s924_s17  ;;  %p928_p5 = scmp.lt.u32.totalorder %s924_s17, %s1194_s5 }
  0x49   :  { %p930_p6 = pnand %p928_p5, %p925_p4 }
  0x4b   :  { %933 = shalt.err (!%p930_p6)
}
  0x4c   :  { %s934_s24 = scalar_lea.vmem %s73_s27, 384  ;;  %p939_p8 = scmp.lt.s32.totalorder %s73_s27, %s73_s27 }
  0x4d   :  { %p935_p7 = scmp.ne.s32.totalorder %s73_s27, %s934_s24  ;;  %p940_p9 = scmp.lt.s32.totalorder %s934_s24, %s934_s24 }
  0x4f   :  { %p941_p10 = por %p940_p9, %p939_p8 }
  0x51   :  { %p942_p11 = pnand %p941_p10, %p935_p7 }
  0x53   :  { %945 = shalt.err (!%p942_p11)
}
  0x54   :  { %78 = dma.hbm_to_vmem [thread:$0]  %s1194_s5, 384, %s73_s27, [#allocation9], %s977_s15, %s977_s15, %s978_s16  }
  0x55   :  { %968 = dma.done.wait [#allocation3], 256  }
  0x56   :  { %969 = vsyncadd [#allocation3], 4294967040 }
  0x57   :  { %970 = dma.done.wait [#allocation6], 512  }
  0x58   :  { %971 = vsyncadd [#allocation6], 4294966784 }
  0x59   :  { %972 = dma.done.wait [#allocation9], 640  }
  0x5a   :  { %973 = vsyncadd [#allocation9], 4294966656  ;;  %v985_v0 = vmov 0.0   ;;  %vm986_vm0 = vmmov 0   ;;  %v817_v1 = vld [vmem:[#allocation7] sm:$0xff]   ;;  %v818_v2 = vld [vmem:[#allocation7 + $0x8] sm:$0xff]   ;;  %v281_v27 = vlaneseq }
  0x5b   :  { %751 = vmatprep.subr.bf16.mxu1 %v985_v0  ;;  %743 = vmatprep.subr.bf16.mxu0 %v985_v0  ;;  %v819_v3 = vld [vmem:[#allocation5] sm:$0xff]   ;;  %v99_v4 = vld [vmem:[#allocation2] sm:$0xff]  ;;  %v100_v5 = vld [vmem:[#allocation2 + $0x8] sm:$0xff]  ;;  %vm118_vm1 = vcmask 261120   ;;  %vm290_vm2 = vcmask 130048   ;;  %s987_s1 = smov [#allocation11]  }
  0x5c   :  { %755 = vmatprep.mubr.msk.bf16.mxu1 %vm986_vm0, %v985_v0  ;;  %747 = vmatprep.mubr.msk.bf16.mxu0 %vm986_vm0, %v985_v0  ;;  %v820_v6 = vld [vmem:[#allocation5 + $0x8] sm:$0xff]   ;;  %v101_v7 = vpack.c.bf16 %v100_v5, %v99_v4  ;;  %v821_v8 = vld [vmem:[#allocation8] sm:$0xff]   ;;  %v823_v18 = vld [vmem:[#allocation10 + $0x8] sm:$0xff]   ;;  %v1138_v28 = vshrl.u32 %v281_v27, 7  ;;  %v526_v50 = vand.u32 127, %v281_v27  ;;  %s686_s28 = sshll.u32 %s987_s1, 4  ;;  %s687_s28 = int_to_ptr.vmem [resolvable:$true] %s686_s28 }
  0x5d   :  { %752 = vmatpush3.bf16.msra.mxu1 %v817_v1  ;;  %744 = vmatpush3.bf16.msra.mxu0 %v819_v3  ;;  %v822_v9 = vld [vmem:[#allocation8 + $0x8] sm:$0xff]   ;;  %v824_v21 = vld [vmem:[#allocation10] sm:$0xff]   ;;  %v825_v49 = vld [vmem:[#allocation10 + $0x10] sm:$0xff]   ;;  %p951_p13 = scmp.lt.s32.totalorder %s687_s28, %s687_s28 }
  0x5e   :  { %753 = vmatprep.subr.bf16.mxu1 %v985_v0  ;;  %745 = vmatprep.subr.bf16.mxu0 %v985_v0  ;;  %v341_v29 = vsub.s32 1, %v1138_v28  ;;  %v283_v30 = vsub.s32 0, %v1138_v28  ;;  %v277_v31 = vld [vmem:[%s1193_s4] sm:$0x7]  ;;  %v500_v51 = vadd.s32 8, %v1138_v28  ;;  %v505_v52 = vand.u32 1, %v1138_v28 }
  0x5f   :  { %v531_v53 = vand.u32 1, %v526_v50  ;;  %v827_v27 = vld [vmem:[%s1195_s6 + $0x8] sm:$0xff]  }
  0x60   :  { %v342_v32 = vrot.slane %v277_v31, %v341_v29  ;;  %v284_v33 = vrot.slane %v277_v31, %v283_v30  ;;  %v512_v54 = vand.u32 1, %v500_v51 }
  0x61   :  { %754 = vmatpush3.bf16.msra.mxu1 %v818_v2  ;;  %746 = vmatpush3.bf16.msra.mxu0 %v820_v6  ;;  %vm539_vm3 = vcmp.eq.s32.totalorder %v505_v52, %v531_v53 }
  0x62   :  { %767 = vmatprep.subr.bf16.mxu1 %v985_v0  ;;  %759 = vmatprep.subr.bf16.mxu0 %v985_v0  ;;  %vm540_vm4 = vcmp.eq.s32.totalorder %v512_v54, %v531_v53 }
  0x64   :  { %756 = vmatmul.mubr.msk.bf16.vlgmr.msra.gmra.mrb[0].mxu1 %vm118_vm1, %v101_v7  ;;  %748 = vmatmul.mubr.msk.bf16.vlgmr.msra.gmra.mrb[0].mxu0 %vm118_vm1, %v101_v7 }
  0x65   :  { %769 = vmatprep.mubr.msk.bf16.mxu1 %vm986_vm0, %v985_v0  ;;  %760 = vmatpush3.bf16.msra.mxu0 %v821_v8 }
  0x66   :  { %763 = vmatprep.mubr.msk.bf16.mxu0 %vm986_vm0, %v985_v0  ;;  %761 = vmatprep.subr.bf16.mxu0 %v985_v0 }
  0x69   :  { %762 = vmatpush3.bf16.msra.mxu0 %v822_v9 }
  0x6a   :  { %773 = vmatprep.subr.bf16.mxu0 %v985_v0 }
  0x6c   :  { %764 = vmatmul.mubr.msk.bf16.vlgmr.msra.gmra.mrb[4].mxu0 %vm118_vm1, %v101_v7 }
  0x6d   :  { %775 = vmatprep.mubr.msk.bf16.mxu0 %vm986_vm0, %v985_v0 }
 0x137   :  { %v213_v10 = vpop.f32.mrb[0].mxu1  ;;  %v156_v13 = vpop.f32.mrb[0].mxu0 }
 0x138   :  { %v757_v11 = vpop.f32.mrb[1].mxu1  ;;  %v749_v16 = vpop.f32.mrb[1].mxu0 }
 0x139   :  { %v216_v12 = vpop.f32.mrb[2].mxu1  ;;  %v159_v17 = vpop.f32.mrb[2].mxu0 }
 0x13a   :  { %v338_v14 = vpack.c.bf16 %v216_v12, %v213_v10  ;;  %v758_v15 = vpop.f32.mrb[3].mxu1  ;;  %v280_v19 = vpack.c.bf16 %v159_v17, %v156_v13  ;;  %v750_v20 = vpop.f32.mrb[3].mxu0  ;;  %v398_v10 = vsub.s32 2, %v1138_v28 }
 0x13c   :  { %774 = vmatpush3.bf16.msra.mxu0 %v338_v14  ;;  %768 = vmatpush3.bf16.msra.mxu1 %v280_v19  ;;  %v399_v13 = vrot.slane %v277_v31, %v398_v10  ;;  %v826_v19 = vld [vmem:[%s1195_s6] sm:$0xff]   ;;  %s946_s6 = scalar_lea.vmem %s687_s28, 256 }
 0x13d   :  { %785 = vmatprep.subr.bf16.mxu0 %v985_v0  ;;  %779 = vmatprep.subr.bf16.mxu1 %v985_v0  ;;  %p947_p12 = scmp.ne.s32.totalorder %s687_s28, %s946_s6  ;;  %p952_p0 = scmp.lt.s32.totalorder %s946_s6, %s946_s6 }
 0x13f   :  { %776 = vmatmul.mubr.msk.bf16.vlgmr.msra.gmra.mrb[8].mxu0 %vm290_vm2, %v823_v18  ;;  %770 = vmatmul.mubr.msk.bf16.vlgmr.msra.gmra.mrb[4].mxu1 %vm290_vm2, %v824_v21  ;;  %v270_v22 = vpop.f32.mrb[4].mxu0  ;;  %p953_p1 = por %p952_p0, %p951_p13 }
 0x140   :  { %787 = vmatprep.mubr.msk.bf16.mxu0 %vm986_vm0, %v985_v0  ;;  %v765_v23 = vpop.f32.mrb[5].mxu0  ;;  %781 = vmatprep.mubr.msk.bf16.mxu1 %vm986_vm0, %v985_v0 }
 0x141   :  { %v273_v24 = vpop.f32.mrb[6].mxu0  ;;  %p954_p2 = pnand %p953_p1, %p947_p12 }
 0x142   :  { %v395_v25 = vpack.c.bf16 %v273_v24, %v270_v22  ;;  %v766_v26 = vpop.f32.mrb[7].mxu0 }
 0x144   :  { %780 = vmatpush3.bf16.msra.mxu1 %v395_v25 }
 0x145   :  { %791 = vmatprep.subr.bf16.mxu1 %v985_v0 }
 0x147   :  { %782 = vmatmul.mubr.msk.bf16.vlgmr.msra.gmra.mrb[8].mxu1 %vm290_vm2, %v825_v49 }
 0x148   :  { %793 = vmatprep.mubr.msk.bf16.mxu1 %vm986_vm0, %v985_v0 }
 0x212   :  { %v385_v34 = vpop.f32.mrb[8].mxu0  ;;  %v328_v37 = vpop.f32.mrb[4].mxu1 }
 0x213   :  { %v777_v35 = vpop.f32.mrb[9].mxu0  ;;  %v386_v38 = vadd.f32 %v385_v34, %v342_v32  ;;  %v329_v41 = vadd.f32 %v328_v37, %v284_v33  ;;  %v771_v42 = vpop.f32.mrb[5].mxu1 }
 0x214   :  { %v388_v36 = vpop.f32.mrb[10].mxu0  ;;  %v331_v43 = vpop.f32.mrb[6].mxu1 }
 0x215   :  { %v389_v39 = vadd.f32 %v388_v36, %v342_v32  ;;  %v778_v40 = vpop.f32.mrb[11].mxu0  ;;  %v332_v45 = vadd.f32 %v331_v43, %v284_v33  ;;  %v772_v46 = vpop.f32.mrb[7].mxu1  ;;  %v717_v32 = vld [vmem:[%s1196_s7] ss:$0 sm:$0xff] }
 0x217   :  { %v450_v44 = vpack.c.bf16 %v389_v39, %v386_v38  ;;  %v449_v48 = vpack.c.bf16 %v332_v45, %v329_v41 }
 0x219   :  { %v455_v47 = vsel %vm118_vm1, %v450_v44, 0 }
 0x21a   :  { %786 = vmatpush3.bf16.xpose.msra.mxu0 %v455_v47  ;;  %v442_v11 = vpop.f32.mrb[8].mxu1 }
 0x21b   :  { %797 = vmatprep.subr.bf16.mxu0 %v985_v0  ;;  %v783_v12 = vpop.f32.mrb[9].mxu1  ;;  %v443_v16 = vadd.f32 %v442_v11, %v399_v13 }
 0x21c   :  { %v445_v14 = vpop.f32.mrb[10].mxu1 }
 0x21d   :  { %v784_v15 = vpop.f32.mrb[11].mxu1  ;;  %v446_v17 = vadd.f32 %v445_v14, %v399_v13 }
 0x21f   :  { %v566_v18 = vpack.c.bf16 %v446_v17, %v443_v16 }
 0x221   :  { %788 = vmatmul.mubr.msk.bf16.vlgmr.msra.gmra.mrb[12].mxu0 %vm118_vm1, %v449_v48  ;;  %792 = vmatpush3.bf16.msra.mxu1 %v566_v18 }
 0x222   :  { %801 = vmatprep.mubr.msk.bf16.mxu0 %vm986_vm0, %v985_v0  ;;  %798 = vmatpush3.bf16.msra.mxu0 %v826_v19 }
 0x223   :  { %799 = vmatprep.subr.bf16.mxu0 %v985_v0 }
 0x226   :  { %800 = vmatpush3.bf16.msra.mxu0 %v827_v27 }
 0x2f4   :  { %v491_v55 = vpop.f32.mrb[12].mxu0 }
 0x2f5   :  { %v541_v56 = vsel %vm539_vm3, %v491_v55, -1e+30  ;;  %v789_v57 = vpop.f32.mrb[13].mxu0 }
 0x2f6   :  { %v494_v58 = vpop.f32.mrb[14].mxu0  ;;  %v543_v59 = vsel %vm290_vm2, %v541_v56, -inf }
 0x2f7   :  { %v542_v60 = vsel %vm540_vm4, %v494_v58, -1e+30  ;;  %544 = vmax.xlane.f32.xlu0 %v543_v59  ;;  %v790_v61 = vpop.f32.mrb[15].mxu0 }
 0x2f8   :  { %v546_v62 = vsel %vm290_vm2, %v542_v60, -inf }
 0x2fb   :  { %547 = vmax.xlane.f32.xlu0 %v546_v62 }
 0x384   :  { %v545_v63 = vpop.xlane.xlu0 %544 }
 0x385   :  { %v549_v1 = vsub.f32 %v541_v56, %v545_v63 }
 0x387   :  { %v551_v2 = vmul.f32 1.442695, %v549_v1 }
 0x388   :  { %v548_v3 = vpop.xlane.xlu0 %547 }
 0x389   :  { %828 = vpow2.f32 %v551_v2  ;;  %v550_v4 = vsub.f32 %v542_v60, %v548_v3 }
 0x38b   :  { %v553_v5 = vmul.f32 1.442695, %v550_v4 }
 0x38d   :  { %830 = vpow2.f32 %v553_v5 }
 0x393   :  { %v829_v6 = vpop.eup %828 }
 0x394   :  { %v555_v7 = vsel %vm290_vm2, %v829_v6, 0.0 }
 0x395   :  { %556 = vadd.xlane.f32.xlu1 %v555_v7 }
 0x397   :  { %v831_v8 = vpop.eup %830 }
 0x398   :  { %v558_v9 = vsel %vm290_vm2, %v831_v8, 0.0 }
 0x399   :  { %559 = vadd.xlane.f32.xlu1 %v558_v9 }
 0x422   :  { %v557_v20 = vpop.xlane.xlu1 %556 }
 0x423   :  { %832 = vrcp.f32 %v557_v20 }
 0x426   :  { %v560_v21 = vpop.xlane.xlu1 %559 }
 0x427   :  { %834 = vrcp.f32 %v560_v21 }
 0x42d   :  { %v833_v22 = vpop.eup %832 }
 0x42e   :  { %v563_v24 = vmul.f32 %v833_v22, %v829_v6 }
 0x431   :  { %v835_v23 = vpop.eup %834 }
 0x432   :  { %v564_v25 = vmul.f32 %v835_v23, %v831_v8 }
 0x434   :  { %v565_v26 = vpack.c.bf16 %v564_v25, %v563_v24 }
 0x436   :  { %794 = vmatmul.mubr.msk.bf16.vlgmr.msra.gmra.mrb[12].mxu1 %vm290_vm2, %v565_v26 }
 0x509   :  { %v604_v28 = vpop.f32.mrb[12].mxu1 }
 0x50a   :  { %v795_v29 = vpop.f32.mrb[13].mxu1 }
 0x50b   :  { %v607_v30 = vpop.f32.mrb[14].mxu1 }
 0x50c   :  { %v611_v0 = vpack.c.bf16 %v607_v30, %v604_v28  ;;  %v796_v31 = vpop.f32.mrb[15].mxu1 }
 0x50e   :  { %802 = vmatmul.mubr.msk.bf16.vlgmr.msra.gmra.mrb[16].mxu0 %vm118_vm1, %v611_v0 }
 0x5e1   :  { %v672_v33 = vpop.f32.mrb[16].mxu0 }
 0x5e2   :  { %v673_v34 = vadd.f32 %v717_v32, %v672_v33  ;;  %v803_v35 = vpop.f32.mrb[17].mxu0 }
 0x5e3   :  { %v675_v36 = vpop.f32.mrb[18].mxu0 }
 0x5e4   :  { %679 = vst.msk [vmem:[#allocation11] sm:$0xff] %vm118_vm1, %v673_v34  ;;  %v676_v37 = vadd.f32 %v717_v32, %v675_v36  ;;  %v804_v38 = vpop.f32.mrb[19].mxu0 }
 0x5e6   :  { %680 = vst.msk [vmem:[#allocation11 + $0x8] sm:$0xff] %vm118_vm1, %v676_v37 }
 0x5e7   :  { %957 = shalt.err (!%p954_p2)
}
 0x5e8   :  { %s958_s10 = scalar_lea.hbm %s1197_s8, 256 }
 0x5e9   :  { %p959_p3 = scmp.ne.s32.totalorder %s1197_s8, %s958_s10  ;;  %p962_p4 = scmp.lt.u32.totalorder %s958_s10, %s1197_s8 }
 0x5eb   :  { %p964_p5 = pnand %p962_p4, %p959_p3 }
 0x5ed   :  { %967 = shalt.err (!%p964_p5)
}
 0x5ee   :  { %692 = dma.vmem_to_hbm [thread:$0]  %s687_s28, 256, %s1197_s8, [#allocation4], %s981_s3, %s981_s3, %s982_s20  }
 0x5ef   :  { %974 = dma.done.wait [#allocation4], 256  }
 0x5f0   :  { %975 = vsyncadd [#allocation4], 4294967040 }
 0x5f1   :  { %696 = vsyncpa [#allocation3], 1 }
 0x5f2   :  { %697 = vsyncpa [#allocation6], 1 }
 0x5f3   :  { %698 = vsyncpa [#allocation9], 1 }
 0x5f4   :  { %699 = vsyncpa [#allocation4], 1 }

</bundles_post_ra>
